<compile_context>
chip_gen: v6e
topology: v6e:2x2x1
jax: 0.10.0
libtpu: 0.0.40
codegen_flags: <defaults>
</compile_context>

<pallas_src>
import functools

import numpy as np

import jax
import jax.numpy as jnp
from jax.experimental import pallas as pl
from jax.experimental.pallas import tpu as pltpu

EPS = 1e-5  # PyTorch InstanceNorm2d default eps (affine=False, no running stats)


def _choose_imgs_per_step(batch, hw, target_lanes=1024, min_grid=2):
    """Largest divisor of `batch` such that imgs*hw <= target_lanes while the
    grid stays >= min_grid (keeps both v7x TensorCores busy)."""
    if hw % 128 != 0:
        return 1
    best = 1
    for ips in range(1, batch + 1):
        if batch % ips:
            continue
        if ips * hw > target_lanes:
            break
        if ips == 1 or (batch // ips) >= min_grid:
            best = ips
    return best


def _double_conv_kernel(x_ref, m0_ref, m1_ref, w0_ref, w1_ref, o_ref,
                        *, H, W, imgs, cin, cin_p):
    # x_ref : (imgs, cin, H*W)   f32  images lane-batched per grid step
    # m0_ref: (9*cin_p, imgs*H*W) f32 pre-expanded border masks for conv1
    # m1_ref: (9*cout,  imgs*H*W) f32 pre-expanded border masks for conv2
    # w0_ref: (cout, 9*cin_p)    bf16 conv1 weights, tap-major / channel-minor
    # w1_ref: (cout, 9*cout)     bf16 conv2 weights
    # o_ref : (imgs, cout, H*W)  f32
    HW = H * W
    N = imgs * HW

    # ---- assemble (cin_p, N) input slab: images concatenated along lanes,
    #      channels zero-padded to a sublane multiple in-vreg (no HBM pad;
    #      zero channels x zero weights == no-op) ----
    if imgs == 1:
        x = x_ref[0]
    else:
        x = jnp.concatenate([x_ref[i] for i in range(imgs)], axis=-1)
    if cin_p != cin:
        x = jnp.concatenate([x, jnp.zeros((cin_p - cin, N), x.dtype)], axis=0)

    tap_offsets = [(kh - 1) * W + (kw - 1) for kh in range(3) for kw in range(3)]

    def im2col(a, mask):
        # a: (C, N) f32 -> fused patch (9*C, N) bf16.  For tap offset d the
        # needed pixel is a[:, p + d]; the precomputed mask zeroes every
        # out-of-image tap AND every lane that wrapped across an image
        # boundary in the roll.  Plain aligned multiply (no where/broadcast).
        pieces = [pltpu.roll(a, (-d) % N, axis=1) if d != 0 else a
                  for d in tap_offsets]
        patch = jnp.concatenate(pieces, axis=0)          # tile-aligned concat
        return (patch * mask).astype(jnp.bfloat16)       # bf16 only for MXU

    def inst_norm_relu(a):
        # per-image, per-channel stats over each HW lane segment; single fused
        # reduction pass over the stacked [a ; a*a].
        c = a.shape[0]
        inv_n = 1.0 / HW
        segs = []
        for i in range(imgs):
            seg = a[:, i * HW:(i + 1) * HW]
            s = jnp.sum(jnp.concatenate([seg, seg * seg], axis=0),
                        axis=-1, keepdims=True)          # (2c, 1)
            mean = s[:c] * inv_n
            var = s[c:] * inv_n - mean * mean
            segs.append(jnp.maximum((seg - mean) * jax.lax.rsqrt(var + EPS),
                                    0.0))
        return segs[0] if imgs == 1 else jnp.concatenate(segs, axis=-1)

    y = inst_norm_relu(jnp.dot(w0_ref[...], im2col(x, m0_ref[...]),
                               preferred_element_type=jnp.float32))
    z = inst_norm_relu(jnp.dot(w1_ref[...], im2col(y, m1_ref[...]),
                               preferred_element_type=jnp.float32))

    for i in range(imgs):
        o_ref[i] = z[:, i * HW:(i + 1) * HW].astype(o_ref.dtype)


def pack_inconv_params(params, H, W, batch, target_lanes=1024):
    """One-time host-side packing (call at init, NOT per forward).
    - weights -> (Cout, 9*Cin_p) bf16 tap-major/channel-minor matrices
    - 3x3 border masks -> pre-expanded (9*C, imgs*HW) f32 operands
    - chooses images-per-grid-step for lane batching.
    Conv biases are dropped: a per-channel constant is exactly cancelled by the
    affine-free InstanceNorm that immediately follows each conv.  Only valid
    for unet_norm='instance_norm' (guarded by this module config)."""
    w0, _b0, w1, _b1 = params
    cin, cout = w0.shape[2], w0.shape[3]
    assert cout % 8 == 0, "kernel assumes Cout is a multiple of 8 sublanes"
    cin_p = max(8, -(-cin // 8) * 8)
    hw = H * W
    imgs = _choose_imgs_per_step(batch, hw, target_lanes=target_lanes)

    def pack_w(w, ci, ci_p):
        # (3,3,Ci,Co) -> (Co,3,3,Ci[pad]) -> (Co, 9*Ci_p) tap-major/ch-minor.
        w = jnp.transpose(w, (3, 0, 1, 2)).astype(jnp.float32)
        if ci_p != ci:
            w = jnp.pad(w, ((0, 0), (0, 0), (0, 0), (0, ci_p - ci)))
        return w.reshape(cout, 9 * ci_p).astype(jnp.bfloat16)

    def tap_masks(channels):
        # (9*channels, imgs*hw) f32: row (tap, ch) = 1 iff the tap's source
        # pixel lies inside the image ('zeros' padding mode only).
        pos = np.arange(hw)
        hh, ww = pos // W, pos % W
        rows = []
        for kh in range(3):
            for kw in range(3):
                dh, dw = kh - 1, kw - 1
                rows.append(((hh + dh >= 0) & (hh + dh < H) &
                             (ww + dw >= 0) & (ww + dw < W)).astype(np.float32))
        m = np.repeat(np.stack(rows, 0), channels, axis=0)   # (9*C, hw)
        return jnp.asarray(np.tile(m, (1, imgs)))            # (9*C, imgs*hw)

    return dict(
        w0=pack_w(w0, cin, cin_p), w1=pack_w(w1, cout, cout),
        m0=tap_masks(cin_p), m1=tap_masks(cout),
        cin=cin, cin_p=cin_p, cout=cout, H=H, W=W, batch=batch, imgs=imgs)


def inconv_forward(x_nchw, packed):
    """x_nchw: (B, Cin, H, W) float32 -> (B, Cout, H, W) float32."""
    B, Cin, H, W = x_nchw.shape
    assert (B, Cin, H, W) == (packed["batch"], packed["cin"],
                              packed["H"], packed["W"])
    imgs, cin_p, cout = packed["imgs"], packed["cin_p"], packed["cout"]
    hw = H * W
    n = imgs * hw
    grid = B // imgs

    x_flat = x_nchw.reshape(B, Cin, hw)          # contiguous reshape: free
    if x_flat.dtype != jnp.float32:
        x_flat = x_flat.astype(jnp.float32)

    kernel = functools.partial(_double_conv_kernel, H=H, W=W, imgs=imgs,
                               cin=Cin, cin_p=cin_p)
    out = pl.pallas_call(
        kernel,
        out_shape=jax.ShapeDtypeStruct((B, cout, hw), jnp.float32),
        grid_spec=pltpu.PrefetchScalarGridSpec(
            num_scalar_prefetch=0,
            grid=(grid,),
            in_specs=[
                pl.BlockSpec((imgs, Cin, hw), lambda g: (g, 0, 0)),
                pl.BlockSpec((9 * cin_p, n), lambda g: (0, 0)),
                pl.BlockSpec((9 * cout, n), lambda g: (0, 0)),
                pl.BlockSpec((cout, 9 * cin_p), lambda g: (0, 0)),
                pl.BlockSpec((cout, 9 * cout), lambda g: (0, 0)),
            ],
            out_specs=pl.BlockSpec((imgs, cout, hw), lambda g: (g, 0, 0)),
        ),
        compiler_params=pltpu.CompilerParams(
            dimension_semantics=("parallel",)),
    )(x_flat, packed["m0"], packed["m1"], packed["w0"], packed["w1"])

    return out.reshape(B, cout, H, W)


def _ref_forward(x_nchw, params):
    """Pure-JAX f32 reference matching the PyTorch semantics (NCHW, with bias)."""
    w0, b0, w1, b1 = params

    def conv(x, w, b):
        w_oihw = jnp.transpose(w, (3, 2, 0, 1))   # (3,3,Ci,Co) -> (Co,Ci,3,3)
        y = jax.lax.conv_general_dilated(
            x, w_oihw, window_strides=(1, 1), padding=((1, 1), (1, 1)),
            dimension_numbers=("NCHW", "OIHW", "NCHW"),
            precision=jax.lax.Precision.HIGHEST)
        return y + b.reshape(1, -1, 1, 1)

    def inorm(x):
        mean = jnp.mean(x, axis=(2, 3), keepdims=True)
        var = jnp.mean((x - mean) ** 2, axis=(2, 3), keepdims=True)
        return (x - mean) * jax.lax.rsqrt(var + EPS)

    y = jax.nn.relu(inorm(conv(x_nchw, w0, b0)))
    y = jax.nn.relu(inorm(conv(y, w1, b1)))
    return y


if __name__ == "__main__":
    B, Cin, Cout, H, W = 2, 4, 8, 16, 16
    key = jax.random.PRNGKey(0)
    kx, kw0, kb0, kw1, kb1 = jax.random.split(key, 5)

    x = jax.random.normal(kx, (B, Cin, H, W), jnp.float32)
    # deterministic synthetic parameters (shapes from nn.Conv2d(in, out, 3))
    w0 = 0.1 * jax.random.normal(kw0, (3, 3, Cin, Cout), jnp.float32)
    b0 = 0.1 * jax.random.normal(kb0, (Cout,), jnp.float32)
    w1 = 0.1 * jax.random.normal(kw1, (3, 3, Cout, Cout), jnp.float32)
    b1 = 0.1 * jax.random.normal(kb1, (Cout,), jnp.float32)
    params = (w0, b0, w1, b1)

    packed = pack_inconv_params(params, H, W, batch=B)   # one-time init
    out = jax.block_until_ready(inconv_forward(x, packed))
    ref = jax.block_until_ready(_ref_forward(x, params))

    assert out.shape == (B, Cout, H, W), out.shape
    # Kernel runs the matmuls with bf16 MXU operands; compare against the f32
    # HIGHEST reference with a bf16-level tolerance.
    max_err = float(jnp.max(jnp.abs(out - ref)))
    assert jnp.allclose(out, ref, rtol=2e-2, atol=2e-2), max_err
    print("KERNEL_OK")
</pallas_src>

<mosaic_0001>
module attributes {stable_mosaic.version = 11 : i64} {
  func.func @_double_conv_kernel(%arg0: i32, %arg1: memref<1x4x256xf32, #tpu.memory_space<vmem>>, %arg2: memref<72x256xf32, #tpu.memory_space<vmem>>, %arg3: memref<72x256xf32, #tpu.memory_space<vmem>>, %arg4: memref<8x72xbf16, #tpu.memory_space<vmem>>, %arg5: memref<8x72xbf16, #tpu.memory_space<vmem>>, %arg6: memref<1x8x256xf32, #tpu.memory_space<vmem>>) attributes {dimension_semantics = [#tpu.dimension_semantics<parallel>], iteration_bounds = array<i64: 2>, scalar_prefetch = 0 : i64, scratch_operands = 0 : i64, tpu.core_type = #tpu.core_type<tc>, window_params = [{transform_indices = @transform_0, window_bounds = array<i64: 1, 4, 256>}, {pipeline_mode = #tpu.pipeline_mode<synchronous>, transform_indices = @transform_1, window_bounds = array<i64: 72, 256>}, {pipeline_mode = #tpu.pipeline_mode<synchronous>, transform_indices = @transform_2, window_bounds = array<i64: 72, 256>}, {pipeline_mode = #tpu.pipeline_mode<synchronous>, transform_indices = @transform_3, window_bounds = array<i64: 8, 72>}, {pipeline_mode = #tpu.pipeline_mode<synchronous>, transform_indices = @transform_4, window_bounds = array<i64: 8, 72>}, {transform_indices = @transform_5, window_bounds = array<i64: 1, 8, 256>}]} {
    %c0 = arith.constant 0 : index
    %c0_0 = arith.constant 0 : index
    %c0_1 = arith.constant 0 : index
    %0 = vector.load %arg1[%c0, %c0_0, %c0_1] : memref<1x4x256xf32, #tpu.memory_space<vmem>>, vector<1x4x256xf32>
    %1 = vector.shape_cast %0 : vector<1x4x256xf32> to vector<4x256xf32>
    %cst = arith.constant 0.000000e+00 : f32
    %2 = vector.broadcast %cst : f32 to vector<4x256xf32>
    %3 = tpu.concatenate %1, %2 in 0 : vector<4x256xf32>, vector<4x256xf32> -> vector<8x256xf32>
    %c0_2 = arith.constant 0 : index
    %c0_3 = arith.constant 0 : index
    %4 = vector.load %arg4[%c0_2, %c0_3] : memref<8x72xbf16, #tpu.memory_space<vmem>>, vector<8x72xbf16>
    %c0_4 = arith.constant 0 : index
    %c0_5 = arith.constant 0 : index
    %5 = vector.load %arg2[%c0_4, %c0_5] : memref<72x256xf32, #tpu.memory_space<vmem>>, vector<72x256xf32>
    %c17_i32 = arith.constant 17 : i32
    %6 = tpu.dynamic_rotate %3 by %c17_i32 dim 1 : vector<8x256xf32>, i32 -> vector<8x256xf32>
    %c16_i32 = arith.constant 16 : i32
    %7 = tpu.dynamic_rotate %3 by %c16_i32 dim 1 : vector<8x256xf32>, i32 -> vector<8x256xf32>
    %c15_i32 = arith.constant 15 : i32
    %8 = tpu.dynamic_rotate %3 by %c15_i32 dim 1 : vector<8x256xf32>, i32 -> vector<8x256xf32>
    %c1_i32 = arith.constant 1 : i32
    %9 = tpu.dynamic_rotate %3 by %c1_i32 dim 1 : vector<8x256xf32>, i32 -> vector<8x256xf32>
    %c255_i32 = arith.constant 255 : i32
    %10 = tpu.dynamic_rotate %3 by %c255_i32 dim 1 : vector<8x256xf32>, i32 -> vector<8x256xf32>
    %c241_i32 = arith.constant 241 : i32
    %11 = tpu.dynamic_rotate %3 by %c241_i32 dim 1 : vector<8x256xf32>, i32 -> vector<8x256xf32>
    %c240_i32 = arith.constant 240 : i32
    %12 = tpu.dynamic_rotate %3 by %c240_i32 dim 1 : vector<8x256xf32>, i32 -> vector<8x256xf32>
    %c239_i32 = arith.constant 239 : i32
    %13 = tpu.dynamic_rotate %3 by %c239_i32 dim 1 : vector<8x256xf32>, i32 -> vector<8x256xf32>
    %14 = tpu.concatenate %6, %7, %8, %9, %3, %10, %11, %12, %13 in 0 : vector<8x256xf32>, vector<8x256xf32>, vector<8x256xf32>, vector<8x256xf32>, vector<8x256xf32>, vector<8x256xf32>, vector<8x256xf32>, vector<8x256xf32>, vector<8x256xf32> -> vector<72x256xf32>
    %15 = arith.mulf %14, %5 : vector<72x256xf32>
    %16 = arith.truncf %15 : vector<72x256xf32> to vector<72x256xbf16>
    %cst_6 = arith.constant dense<0.000000e+00> : vector<8x256xf32>
    %17 = tpu.matmul %4, %16, %cst_6 {dimension_numbers = #tpu.dot_dimension_numbers<[1], [0], [0], [1], [0, 0, 1, 1], [], []>} : vector<8x72xbf16>, vector<72x256xbf16>, vector<8x256xf32> -> vector<8x256xf32>
    %18 = arith.mulf %17, %17 : vector<8x256xf32>
    %19 = tpu.concatenate %17, %18 in 0 : vector<8x256xf32>, vector<8x256xf32> -> vector<16x256xf32>
    %cst_7 = arith.constant dense<0.000000e+00> : vector<16xf32>
    %20 = vector.multi_reduction <add>, %19, %cst_7 [1] : vector<16x256xf32> to vector<16xf32>
    %21 = vector.shape_cast %20 : vector<16xf32> to vector<16x1xf32>
    %22 = vector.extract_strided_slice %21 {offsets = [0, 0], sizes = [8, 1], strides = [1, 1]} : vector<16x1xf32> to vector<8x1xf32>
    %cst_8 = arith.constant 3.906250e-03 : f32
    %23 = vector.broadcast %cst_8 : f32 to vector<8x1xf32>
    %24 = arith.mulf %22, %23 : vector<8x1xf32>
    %25 = vector.extract_strided_slice %21 {offsets = [8, 0], sizes = [8, 1], strides = [1, 1]} : vector<16x1xf32> to vector<8x1xf32>
    %cst_9 = arith.constant 3.906250e-03 : f32
    %26 = vector.broadcast %cst_9 : f32 to vector<8x1xf32>
    %27 = arith.mulf %25, %26 : vector<8x1xf32>
    %28 = arith.mulf %24, %24 : vector<8x1xf32>
    %29 = arith.subf %27, %28 : vector<8x1xf32>
    %30 = vector.broadcast %24 : vector<8x1xf32> to vector<8x256xf32>
    %31 = arith.subf %17, %30 : vector<8x256xf32>
    %cst_10 = arith.constant 9.99999974E-6 : f32
    %32 = vector.broadcast %cst_10 : f32 to vector<8x1xf32>
    %33 = arith.addf %29, %32 : vector<8x1xf32>
    %34 = math.rsqrt %33 : vector<8x1xf32>
    %35 = vector.broadcast %34 : vector<8x1xf32> to vector<8x256xf32>
    %36 = arith.mulf %31, %35 : vector<8x256xf32>
    %cst_11 = arith.constant 0.000000e+00 : f32
    %37 = vector.broadcast %cst_11 : f32 to vector<8x256xf32>
    %38 = arith.maximumf %36, %37 : vector<8x256xf32>
    %c0_12 = arith.constant 0 : index
    %c0_13 = arith.constant 0 : index
    %39 = vector.load %arg5[%c0_12, %c0_13] : memref<8x72xbf16, #tpu.memory_space<vmem>>, vector<8x72xbf16>
    %c0_14 = arith.constant 0 : index
    %c0_15 = arith.constant 0 : index
    %40 = vector.load %arg3[%c0_14, %c0_15] : memref<72x256xf32, #tpu.memory_space<vmem>>, vector<72x256xf32>
    %c17_i32_16 = arith.constant 17 : i32
    %41 = tpu.dynamic_rotate %38 by %c17_i32_16 dim 1 : vector<8x256xf32>, i32 -> vector<8x256xf32>
    %c16_i32_17 = arith.constant 16 : i32
    %42 = tpu.dynamic_rotate %38 by %c16_i32_17 dim 1 : vector<8x256xf32>, i32 -> vector<8x256xf32>
    %c15_i32_18 = arith.constant 15 : i32
    %43 = tpu.dynamic_rotate %38 by %c15_i32_18 dim 1 : vector<8x256xf32>, i32 -> vector<8x256xf32>
    %c1_i32_19 = arith.constant 1 : i32
    %44 = tpu.dynamic_rotate %38 by %c1_i32_19 dim 1 : vector<8x256xf32>, i32 -> vector<8x256xf32>
    %c255_i32_20 = arith.constant 255 : i32
    %45 = tpu.dynamic_rotate %38 by %c255_i32_20 dim 1 : vector<8x256xf32>, i32 -> vector<8x256xf32>
    %c241_i32_21 = arith.constant 241 : i32
    %46 = tpu.dynamic_rotate %38 by %c241_i32_21 dim 1 : vector<8x256xf32>, i32 -> vector<8x256xf32>
    %c240_i32_22 = arith.constant 240 : i32
    %47 = tpu.dynamic_rotate %38 by %c240_i32_22 dim 1 : vector<8x256xf32>, i32 -> vector<8x256xf32>
    %c239_i32_23 = arith.constant 239 : i32
    %48 = tpu.dynamic_rotate %38 by %c239_i32_23 dim 1 : vector<8x256xf32>, i32 -> vector<8x256xf32>
    %49 = tpu.concatenate %41, %42, %43, %44, %38, %45, %46, %47, %48 in 0 : vector<8x256xf32>, vector<8x256xf32>, vector<8x256xf32>, vector<8x256xf32>, vector<8x256xf32>, vector<8x256xf32>, vector<8x256xf32>, vector<8x256xf32>, vector<8x256xf32> -> vector<72x256xf32>
    %50 = arith.mulf %49, %40 : vector<72x256xf32>
    %51 = arith.truncf %50 : vector<72x256xf32> to vector<72x256xbf16>
    %cst_24 = arith.constant dense<0.000000e+00> : vector<8x256xf32>
    %52 = tpu.matmul %39, %51, %cst_24 {dimension_numbers = #tpu.dot_dimension_numbers<[1], [0], [0], [1], [0, 0, 1, 1], [], []>} : vector<8x72xbf16>, vector<72x256xbf16>, vector<8x256xf32> -> vector<8x256xf32>
    %53 = arith.mulf %52, %52 : vector<8x256xf32>
    %54 = tpu.concatenate %52, %53 in 0 : vector<8x256xf32>, vector<8x256xf32> -> vector<16x256xf32>
    %cst_25 = arith.constant dense<0.000000e+00> : vector<16xf32>
    %55 = vector.multi_reduction <add>, %54, %cst_25 [1] : vector<16x256xf32> to vector<16xf32>
    %56 = vector.shape_cast %55 : vector<16xf32> to vector<16x1xf32>
    %57 = vector.extract_strided_slice %56 {offsets = [0, 0], sizes = [8, 1], strides = [1, 1]} : vector<16x1xf32> to vector<8x1xf32>
    %cst_26 = arith.constant 3.906250e-03 : f32
    %58 = vector.broadcast %cst_26 : f32 to vector<8x1xf32>
    %59 = arith.mulf %57, %58 : vector<8x1xf32>
    %60 = vector.extract_strided_slice %56 {offsets = [8, 0], sizes = [8, 1], strides = [1, 1]} : vector<16x1xf32> to vector<8x1xf32>
    %cst_27 = arith.constant 3.906250e-03 : f32
    %61 = vector.broadcast %cst_27 : f32 to vector<8x1xf32>
    %62 = arith.mulf %60, %61 : vector<8x1xf32>
    %63 = arith.mulf %59, %59 : vector<8x1xf32>
    %64 = arith.subf %62, %63 : vector<8x1xf32>
    %65 = vector.broadcast %59 : vector<8x1xf32> to vector<8x256xf32>
    %66 = arith.subf %52, %65 : vector<8x256xf32>
    %cst_28 = arith.constant 9.99999974E-6 : f32
    %67 = vector.broadcast %cst_28 : f32 to vector<8x1xf32>
    %68 = arith.addf %64, %67 : vector<8x1xf32>
    %69 = math.rsqrt %68 : vector<8x1xf32>
    %70 = vector.broadcast %69 : vector<8x1xf32> to vector<8x256xf32>
    %71 = arith.mulf %66, %70 : vector<8x256xf32>
    %cst_29 = arith.constant 0.000000e+00 : f32
    %72 = vector.broadcast %cst_29 : f32 to vector<8x256xf32>
    %73 = arith.maximumf %71, %72 : vector<8x256xf32>
    %c0_30 = arith.constant 0 : index
    %c0_31 = arith.constant 0 : index
    %c0_32 = arith.constant 0 : index
    %74 = vector.load %arg6[%c0_30, %c0_31, %c0_32] : memref<1x8x256xf32, #tpu.memory_space<vmem>>, vector<1x8x256xf32>
    %75 = vector.shape_cast %74 : vector<1x8x256xf32> to vector<8x256xf32>
    %76 = vector.shape_cast %73 : vector<8x256xf32> to vector<1x8x256xf32>
    tpu.vector_store %arg6[%c0_30, %c0_31, %c0_32], %76 {strides = array<i32>} : memref<1x8x256xf32, #tpu.memory_space<vmem>>, vector<1x8x256xf32>,
    return
  }
  func.func @transform_0(%arg0: i32) -> (i32, i32, i32) {
    %c0_i32 = arith.constant 0 : i32
    %c0_i32_0 = arith.constant 0 : i32
    %c0_i32_1 = arith.constant 0 : i32
    return %arg0, %c0_i32, %c0_i32_0 : i32, i32, i32
  }
  func.func @transform_1(%arg0: i32) -> (i32, i32) {
    %c0_i32 = arith.constant 0 : i32
    %c0_i32_0 = arith.constant 0 : i32
    %c0_i32_1 = arith.constant 0 : i32
    return %c0_i32, %c0_i32_0 : i32, i32
  }
  func.func @transform_2(%arg0: i32) -> (i32, i32) {
    %c0_i32 = arith.constant 0 : i32
    %c0_i32_0 = arith.constant 0 : i32
    %c0_i32_1 = arith.constant 0 : i32
    return %c0_i32, %c0_i32_0 : i32, i32
  }
  func.func @transform_3(%arg0: i32) -> (i32, i32) {
    %c0_i32 = arith.constant 0 : i32
    %c0_i32_0 = arith.constant 0 : i32
    %c0_i32_1 = arith.constant 0 : i32
    return %c0_i32, %c0_i32_0 : i32, i32
  }
  func.func @transform_4(%arg0: i32) -> (i32, i32) {
    %c0_i32 = arith.constant 0 : i32
    %c0_i32_0 = arith.constant 0 : i32
    %c0_i32_1 = arith.constant 0 : i32
    return %c0_i32, %c0_i32_0 : i32, i32
  }
  func.func @transform_5(%arg0: i32) -> (i32, i32, i32) {
    %c0_i32 = arith.constant 0 : i32
    %c0_i32_0 = arith.constant 0 : i32
    %c0_i32_1 = arith.constant 0 : i32
    return %arg0, %c0_i32, %c0_i32_0 : i32, i32, i32
  }
}

</mosaic_0001>

<bundles_post_ra>
// kernel: tpu_custom_call.1
= control target key start
LH: loop header
LB: loop body
LE: loop exit
PB: predicated region body
PF: predicated region fallthrough
CT: control target
= control target key end

     0   :  { %10 = vsyncpa [#allocation3], 0  ;;  %s1405_s0 = inlined_call_operand.hbm [shape: f32[2,4,256], index: 0, kind: input, shape index: {}]   ;;  %s1406_s1 = inlined_call_operand.hbm [shape: f32[72,256], index: 1, kind: input, shape index: {}]   ;;  %s1407_s2 = inlined_call_operand.hbm [shape: f32[72,256], index: 2, kind: input, shape index: {}]   ;;  %s1408_s3 = inlined_call_operand.vmem [shape: bf16[8,72], index: 3, kind: input, shape index: {}]   ;;  %s1409_s4 = inlined_call_operand.hbm [shape: bf16[8,72], index: 4, kind: input, shape index: {}]   ;;  %s1410_s5 = inlined_call_operand.hbm [shape: f32[2,8,256], index: 5, kind: output, shape index: {}]  }
   0x1   :  { %12 = vsyncpa [#allocation3 + $0x1], 0 }
   0x2   :  { %13 = vsyncpa [#allocation6], 0 }
   0x3   :  { %14 = vsyncpa [#allocation9], 0 }
   0x4   :  { %15 = vsyncpa [#allocation4], 0 }
   0x5   :  { %17 = vsyncpa [#allocation4 + $0x1], 0  ;;  %s1093_s18 = smov 0   ;;  %s1095_s19 = smov 0  }
   0x6   :  { %s1097_s20 = smov 0   ;;  %s1099_s21 = smov 0  }
   0x7 LB: > { %s1114_s22 = sadd.s32 4294967295, %s1045_s21   ;;  %s748_s23 = sadd.s32 4294967294, %s1045_s21   ;;  %s1045_s21 = sphi %s1099_s21, %s1434_s21   ;;  %s1041_s20 = sphi %s1097_s20, %s1433_s20   ;;  %s1037_s19 = sphi %s1095_s19, %s1432_s19   ;;  %s1033_s18 = sphi %s1093_s18, %s1431_s18  }
   0x8   : > { %p43_p0 = scmp.ne.s32.totalorder %s1037_s19, %s1033_s18  ;;  %p1411_p1 = scmp.eq.s32.totalorder %s1114_s22, 0 }
   0x9   : > { %p157_p3 = scmp.eq.s32.totalorder %s748_s23, 1  ;;  %p749_p5 = scmp.ge.s32.totalorder %s1045_s21, 1 }
   0xa   : > { %p1123_p4 = por %p1411_p1, %p43_p0  ;;  %p164_p7 = scmp.lt.s32.totalorder %s1045_s21, 3 }
   0xb   : > { %p1128_p6 = por %p157_p3, %p43_p0  ;;  %s1047_s27 = smov [#allocation5]  }
   0xc   : > { %s1415_s24 = scalar_select %p1123_p4, 1, 0 }
   0xd   : > { %s1416_s25 = scalar_select %p1128_p6, 1, 0 }
   0xe   : > { %p1133_p8 = pnand %p749_p5, %p164_p7  ;;  %s176_s28 = sshll.u32 %s1047_s27, 4  ;;  %s177_s28 = int_to_ptr.vmem [resolvable:$true] %s176_s28 }
   0xf   : > { %s1048_s30 = smov [#allocation7]   ;;  %s1049_s7 = smov [#allocation8]  }
  0x10   : > { %s1417_s26 = scalar_select %p1133_p8, 1, 0 }
  0x11   : > { %p790_p9 = pneg %p1133_p8  ;;  %s189_s6 = sshll.u32 %s1048_s30, 4  ;;  %s190_s6 = int_to_ptr.vmem [resolvable:$true] %s189_s6 }
  0x12   : > { %s206_s8 = sshll.u32 %s1049_s7, 4  ;;  %s878_s9 = scalar_lea.vmem %s177_s28, 2304  ;;  %s207_s8 = int_to_ptr.vmem [resolvable:$true] %s206_s8 }
  0x13   : > { %p1142_p11 = pnand %p790_p9, %p1411_p1  ;;  %p879_p13 = scmp.ne.s32.totalorder %s177_s28, %s878_s9 }
  0x14   : > { %p886_p5 = scmp.lt.s32.totalorder %s177_s28, %s177_s28  ;;  %p887_p7 = scmp.lt.s32.totalorder %s878_s9, %s878_s9 }
  0x15   : > { %p869_p12 = pneg %p1142_p11 }
  0x16   : > { %p888_p9 = por %p887_p7, %p886_p5 }
  0x17   : > { %p881_p0 = pnand %p879_p13, %p869_p12 }
  0x19   : > { %p882_p3 = pneg %p881_p0 }
  0x1b   : > { %p889_p10 = pnand %p888_p9, %p882_p3 }
  0x1d   : > { %892 = shalt.err (!%p889_p10)
}
  0x1e   : > { %s1050_s10 = smov 256   ;;  %s1051_s11 = smov 16  }
  0x1f   : > { %793 = dma.hbm_to_vmem [thread:$0]  (!%p1142_p11), %s1406_s1, 2304, %s177_s28, [#allocation6], %s1050_s10, %s1050_s10, %s1051_s11  }
  0x20   : > { %s904_s14 = scalar_lea.vmem %s190_s6, 2304  ;;  %p912_p2 = scmp.lt.s32.totalorder %s190_s6, %s190_s6 }
  0x21   : > { %p905_p1 = scmp.ne.s32.totalorder %s190_s6, %s904_s14  ;;  %p913_p6 = scmp.lt.s32.totalorder %s904_s14, %s904_s14 }
  0x23   : > { %p907_p13 = pnand %p905_p1, %p869_p12  ;;  %p914_p5 = por %p913_p6, %p912_p2 }
  0x25   : > { %p908_p0 = pneg %p907_p13 }
  0x27   : > { %p915_p3 = pnand %p914_p5, %p908_p0 }
  0x29   : > { %918 = shalt.err (!%p915_p3)
}
  0x2a   : > { %796 = dma.hbm_to_vmem [thread:$0]  (!%p1142_p11), %s1407_s2, 2304, %s190_s6, [#allocation6], %s1050_s10, %s1050_s10, %s1051_s11  }
  0x2b   : > { %s930_s17 = scalar_lea.vmem %s207_s8, 64  ;;  %p938_p9 = scmp.lt.s32.totalorder %s207_s8, %s207_s8 }
  0x2c   : > { %p931_p10 = scmp.ne.s32.totalorder %s207_s8, %s930_s17  ;;  %p939_p13 = scmp.lt.s32.totalorder %s930_s17, %s930_s17 }
  0x2e   : > { %p933_p7 = pnand %p931_p10, %p869_p12  ;;  %p940_p4 = por %p939_p13, %p938_p9 }
  0x30   : > { %p934_p1 = pneg %p933_p7 }
  0x32   : > { %p941_p2 = pnand %p940_p4, %p934_p1 }
  0x34   : > { %944 = shalt.err (!%p941_p2)
}
  0x35   : > { %799 = dma.hbm_to_vmem [thread:$0]  (!%p1142_p11), %s1409_s4, 64, %s207_s8, [#allocation9]  }
  0x36   : > { %s1173_s28 = sadd.s32 1, %s1045_s21   ;;  %s30_s29 = sadd.s32 1, %s1041_s20 }
  0x37   : > { %s27_s30 = ssub.s32 %s1045_s21, %s1173_s28  ;;  %p37_p6 = scmp.ne.s32.totalorder %s1041_s20, %s1037_s19 }
  0x38   : > { %p28_p4 = scmp.eq.s32.totalorder %s27_s30, 0  ;;  %p38_p12 = scmp.eq.s32.totalorder %s1045_s21, 0 }
  0x39   : > { %p811_p0 = scmp.lt.s32.totalorder %s1045_s21, 2  ;;  %p1419_p3 = scmp.eq.s32.totalorder %s1114_s22, 1 }
  0x3a   : > { %s1183_s6 = scalar_select %p28_p4, %s1041_s20, %s30_s29  }
  0x3b   : > { %p39_p5 = por %p38_p12, %p37_p6  ;;  %p1187_p10 = por %p1419_p3, %p37_p6 }
  0x3c   : > { %s217_s9 = sand.u32 1, %s1041_s20   ;;  %s772_s10 = sshll.u32 %s1045_s21, 7 }
  0x3d   : > { %s1420_s7 = scalar_select %p1187_p10, 1, 0 }
  0x3e   : > { %s754_s8 = sshll.u32 %s217_s9, 3  ;;  %s1196_s13 = scalar_lea.hbm %s1405_s0, %s772_s10 }
  0x3f   : > { %s221_s14 = scalar_lea.vmem [#allocation2], %s754_s8  ;;  %p1198_p11 = pnand %p811_p0, %p39_p5 }
  0x40   : > { %s229_s15 = sshll.u32 %s221_s14, 4  ;;  %s218_s17 = scalar_lea.sflag [#allocation3], %s217_s9  ;;  %s230_s15 = int_to_ptr.vmem [resolvable:$true] %s229_s15 }
  0x41   : > { %s945_s23 = scalar_lea.hbm %s1196_s13, 128  ;;  %p947_p1 = pneg %p1198_p11 }
  0x42   : > { %p946_p7 = scmp.ne.s32.totalorder %s1196_s13, %s945_s23  ;;  %s950_s29 = scalar_lea.hbm %s1405_s0, 256 }
  0x43   : > { %p951_p2 = scmp.lt.s32.totalorder %s1196_s13, %s1405_s0  ;;  %p952_p4 = scmp.lt.s32.totalorder %s950_s29, %s945_s23 }
  0x44   : > { %p948_p9 = pnand %p947_p1, %p946_p7 }
  0x45   : > { %p953_p6 = por %p952_p4, %p951_p2 }
  0x46   : > { %p949_p13 = pneg %p948_p9 }
  0x48   : > { %p954_p12 = pnand %p953_p6, %p949_p13 }
  0x4a   : > { %957 = shalt.err (!%p954_p12)
}
  0x4b   : > { %s958_s11 = scalar_lea.vmem %s230_s15, 128  ;;  %s1052_s9 = smov [#allocation2]  }
  0x4c   : > { %p959_p0 = scmp.ne.s32.totalorder %s230_s15, %s958_s11  ;;  %s963_s12 = sshll.u32 %s1052_s9, 4  ;;  %s964_s12 = int_to_ptr.vmem [resolvable:$false] %s963_s12 }
  0x4d   : > { %s965_s14 = scalar_lea.vmem %s964_s12, 256  ;;  %p966_p7 = scmp.lt.s32.totalorder %s230_s15, %s964_s12 }
  0x4e   : > { %p961_p5 = pnand %p959_p0, %p947_p1  ;;  %p967_p9 = scmp.lt.s32.totalorder %s965_s14, %s958_s11 }
  0x50   : > { %p962_p3 = pneg %p961_p5  ;;  %p968_p10 = por %p967_p9, %p966_p7 }
  0x52   : > { %p969_p8 = pnand %p968_p10, %p962_p3 }
  0x54   : > { %972 = shalt.err (!%p969_p8)
}
  0x55   : > { %803 = dma.hbm_to_vmem [thread:$0]  (!%p1198_p11), %s1196_s13, 128, %s230_s15, %s218_s17  }
  0x56   : > { %p1422_p13 = scmp.ne.s32.totalorder %s1417_s26, 0 }
  0x57   : > { %s1219_s23 = sand.u32 (!%p1422_p13), 1, %s1037_s19   ;;  %p1423_p1 = scmp.ne.s32.totalorder (!%p1422_p13), %s1415_s24, 0 }
  0x58   : > { %238 = sbr.rel (%p1422_p13) target bundleno = 1141 (0x475), region = 40  ;;  %s758_s27 = sshll.u32 (!%p1422_p13), %s1219_s23, 3 }
  0x59   : > { %s241_s30 = scalar_lea.sflag (!%p1422_p13), [#allocation3], %s1219_s23  ;;  %s244_s29 = scalar_lea.vmem (!%p1422_p13), [#allocation2], %s758_s27 }
  0x5d   : > { %1016 = dma.done.wait (%p1423_p1), %s241_s30, 128  }
  0x5e   : > { %1018 = vsyncadd (%p1423_p1), %s241_s30, 4294967168  ;;  %p1424_p8 = scmp.eq.s32.totalorder %s1114_s22, 0 }
  0x60   : > { %1020 = dma.done.wait (%p1424_p8), [#allocation6], 4608   ;;  %p1425_p10 = pmov %p1424_p8 }
  0x61   : > { %p1426_p11 = pmov %p1424_p8 }
  0x62   : > { %1022 = vsyncadd (%p1425_p10), [#allocation6], 4294962688 }
  0x63   : > { %1024 = dma.done.wait (%p1426_p11), [#allocation9], 64   ;;  %p1427_p2 = pmov %p1424_p8 }
  0x64   : > { %vm288_vm0 = vcmask 1043456   ;;  %v284_v0 = vld [vmem:[%s244_s29] sm:$0xff]  ;;  %s1053_s24 = smov 113   ;;  %s1054_s26 = smov 111   ;;  %v1059_v4 = vmov 0   ;;  %v314_v5 = vlaneseq  ;;  %v308_v12 = vld [vmem:[#allocation5 + $0x80] sm:$0xff] }
  0x65   : > { %1026 = vsyncadd (%p1427_p2), [#allocation9], 4294967232  ;;  %v1236_v1 = vsel %vm288_vm0, %v284_v0, 0.0  ;;  %v286_v2 = vcombine.high %v284_v0, %v284_v0  ;;  %s1055_s13 = smov 112   ;;  %s1056_s15 = smov 127   ;;  %438 = vmatprep.mubr.bf16.mxu0 %v1059_v4  ;;  %603 = vmatprep.mubr.bf16.mxu1 %v1059_v4  ;;  %v307_v11 = vld [vmem:[#allocation5 + $0x78] sm:$0xff] }
  0x66   : > { %347 = vrot.lane.b32.xlu1 %v1236_v1, %s1053_s24  ;;  %361 = vrot.lane.b32.xlu0 %v1236_v1, %s1054_s26  ;;  %s1057_s16 = smov 15   ;;  %s1058_s17 = smov 1   ;;  %v1263_v8 = vand.u32 127, %v314_v5  ;;  %v309_v13 = vld [vmem:[#allocation5 + $0x88] sm:$0xff]  ;;  %v306_v21 = vld [vmem:[#allocation5 + $0x70] sm:$0xff]  ;;  %v303_v27 = vld [vmem:[#allocation5 + $0x58] sm:$0xff] }
  0x67   : > { %v290_v3 = vsel %vm288_vm0, %v286_v2, 0.0  ;;  %s1060_s10 = smov 17   ;;  %s1061_s8 = smov 16   ;;  %v305_v16 = vld [vmem:[#allocation5 + $0x68] sm:$0xff]  ;;  %v304_v28 = vld [vmem:[#allocation5 + $0x60] sm:$0xff]  ;;  %v302_v38 = vld [vmem:[#allocation5 + $0x50] sm:$0xff] }
  0x68   : > { %vm351_vm1 = vcmp.lt.s32.totalorder %v1263_v8, 113  ;;  %vm358_vm2 = vcmp.lt.s32.totalorder %v1263_v8, 112  ;;  %vm365_vm3 = vcmp.lt.s32.totalorder %v1263_v8, 111  ;;  %vm344_vm4 = vcmp.lt.s32.totalorder %v1263_v8, 127  ;;  %v301_v26 = vld [vmem:[#allocation5 + $0x48] sm:$0xff]  ;;  %v300_v43 = vld [vmem:[#allocation5 + $0x40] sm:$0xff] }
  0x69   : > { %v377_v37 = vmul.f32 %v301_v26, %v290_v3  ;;  %vm330_vm5 = vcmp.lt.s32.totalorder %v1263_v8, 15  ;;  %v376_v49 = vmul.f32 %v300_v43, %v1236_v1  ;;  %v296_v50 = vld [vmem:[#allocation5 + $0x20] sm:$0xff]  ;;  %vm337_vm6 = vcmp.lt.s32.totalorder %v1263_v8, 1  ;;  %v297_v52 = vld [vmem:[#allocation5 + $0x28] sm:$0xff]  ;;  %v298_v55 = vld [vmem:[#allocation5 + $0x30] sm:$0xff]  ;;  %s762_s12 = sshll.u32 %s1219_s23, 4 }
  0x6a   : > { %354 = vrot.lane.b32.xlu0 %v1236_v1, %s1055_s13  ;;  %349 = vrot.lane.b32.xlu1 %v290_v3, %s1053_s24  ;;  %v299_v56 = vld [vmem:[#allocation5 + $0x38] sm:$0xff]  ;;  %vm316_vm7 = vcmp.lt.s32.totalorder %v1263_v8, 17  ;;  %vm323_vm8 = vcmp.lt.s32.totalorder %v1263_v8, 16  ;;  %vm396_vm9 = vcmask 588800   ;;  %s773_s14 = sshll.u32 %s1114_s22, 8  ;;  %s282_s27 = scalar_lea.vmem [#allocation10], %s762_s12 }
  0x6b   : > { %s649_s30 = sshll.u32 %s282_s27, 4  ;;  %p1428_p6 = scmp.ne.s32.totalorder %s1420_s7, 0  ;;  %s650_s30 = int_to_ptr.vmem [resolvable:$true] %s649_s30 }
  0x6c   : > { %s1062_s22 = smov [#allocation10]  }
  0x6e   : > { %356 = vrot.lane.b32.xlu1 %v290_v3, %s1055_s13  ;;  %363 = vrot.lane.b32.xlu0 %v290_v3, %s1054_s26 }
  0x72   : > { %342 = vrot.lane.b32.xlu1 %v290_v3, %s1056_s15  ;;  %340 = vrot.lane.b32.xlu0 %v1236_v1, %s1056_s15 }
  0x76   : > { %328 = vrot.lane.b32.xlu1 %v290_v3, %s1057_s16  ;;  %326 = vrot.lane.b32.xlu0 %v1236_v1, %s1057_s16 }
  0x7a   : > { %335 = vrot.lane.b32.xlu1 %v290_v3, %s1058_s17  ;;  %333 = vrot.lane.b32.xlu0 %v1236_v1, %s1058_s17 }
  0x7e   : > { %312 = vrot.lane.b32.xlu1 %v290_v3, %s1060_s10  ;;  %310 = vrot.lane.b32.xlu0 %v1236_v1, %s1060_s10 }
  0x82   : > { %321 = vrot.lane.b32.xlu1 %v290_v3, %s1061_s8  ;;  %319 = vrot.lane.b32.xlu0 %v1236_v1, %s1061_s8 }
  0xd8   : > { %v348_v6 = vpop.permute.xlu1 %347  ;;  %v362_v7 = vpop.permute.xlu0 %361 }
  0xdc   : > { %v355_v9 = vpop.permute.xlu0 %354  ;;  %v350_v10 = vpop.permute.xlu1 %349 }
  0xdd   : > { %v353_v17 = vsel %vm351_vm1, %v350_v10, %v348_v6  ;;  %v352_v29 = vsel %vm351_vm1, %v348_v6, %v350_v10  ;;  %v292_v6 = vld [vmem:[#allocation5] sm:$0xff] }
  0xde   : > { %v381_v30 = vmul.f32 %v353_v17, %v305_v16  ;;  %v380_v44 = vmul.f32 %v352_v29, %v304_v28 }
  0xe0   : > { %v357_v14 = vpop.permute.xlu1 %356  ;;  %v364_v15 = vpop.permute.xlu0 %363 }
  0xe1   : > { %v360_v18 = vsel %vm358_vm2, %v357_v14, %v355_v9  ;;  %v366_v19 = vsel %vm365_vm3, %v362_v7, %v364_v15  ;;  %v367_v20 = vsel %vm365_vm3, %v364_v15, %v362_v7  ;;  %v359_v22 = vsel %vm358_vm2, %v355_v9, %v357_v14  ;;  %v293_v7 = vld [vmem:[#allocation5 + $0x8] sm:$0xff] }
  0xe2   : > { %v383_v23 = vmul.f32 %v360_v18, %v307_v11  ;;  %v384_v24 = vmul.f32 %v366_v19, %v308_v12  ;;  %v385_v25 = vmul.f32 %v367_v20, %v309_v13  ;;  %v382_v35 = vmul.f32 %v359_v22, %v306_v21  ;;  %v294_v11 = vld [vmem:[#allocation5 + $0x10] sm:$0xff]  ;;  %v295_v12 = vld [vmem:[#allocation5 + $0x18] sm:$0xff] }
  0xe4   : > { %v343_v31 = vpop.permute.xlu1 %342  ;;  %v341_v32 = vpop.permute.xlu0 %340  ;;  %v395_v33 = vpack.c.bf16 %v385_v25, %v385_v25  ;;  %v394_v34 = vpack.c.bf16 %v384_v24, %v384_v24  ;;  %v393_v42 = vpack.c.bf16 %v383_v23, %v381_v30  ;;  %v392_v48 = vpack.c.bf16 %v382_v35, %v380_v44  ;;  %v291_v23 = vld [vmem:[%s1408_s3] sm:$0xf] }
  0xe5   : > { %v346_v36 = vsel %vm344_vm4, %v343_v31, %v341_v32  ;;  %v345_v39 = vsel %vm344_vm4, %v341_v32, %v343_v31 }
  0xe6   : > { %v379_v40 = vmul.f32 %v346_v36, %v303_v27  ;;  %763 = vmatprep.subr.msk.bf16.mxu0 %vm288_vm0, %v395_v33  ;;  %v401_v41 = vsel %vm288_vm0, %v394_v34, 0  ;;  %v378_v47 = vmul.f32 %v345_v39, %v302_v38 }
  0xe7   : > { %413 = vmatpush1.bf16.msra.mxu0 %v401_v41 }
  0xe8   : > { %v329_v45 = vpop.permute.xlu1 %328  ;;  %414 = vmatprep.subr.bf16.mxu0 %v393_v42  ;;  %v327_v46 = vpop.permute.xlu0 %326  ;;  %v391_v51 = vpack.c.bf16 %v379_v40, %v377_v37  ;;  %v390_v61 = vpack.c.bf16 %v378_v47, %v376_v49  ;;  %v485_v47 = vld [vmem:[#allocation7 + $0x88] sm:$0xff] }
  0xe9   : > { %v331_v53 = vsel %vm330_vm5, %v327_v46, %v329_v45  ;;  %v332_v54 = vsel %vm330_vm5, %v329_v45, %v327_v46  ;;  %v484_v46 = vld [vmem:[#allocation7 + $0x80] sm:$0xff] }
  0xea   : > { %v372_v62 = vmul.f32 %v332_v54, %v296_v50  ;;  %v373_v63 = vmul.f32 %v331_v53, %v297_v52 }
  0xeb   : > { %415 = vmatpush1.bf16.msra.mxu0 %v392_v48 }
  0xec   : > { %v336_v57 = vpop.permute.xlu1 %335  ;;  %v334_v58 = vpop.permute.xlu0 %333  ;;  %416 = vmatprep.subr.bf16.mxu0 %v391_v51 }
  0xed   : > { %v338_v59 = vsel %vm337_vm6, %v334_v58, %v336_v57  ;;  %v339_v60 = vsel %vm337_vm6, %v336_v57, %v334_v58  ;;  %v480_v58 = vld [vmem:[#allocation7 + $0x60] sm:$0xff] }
  0xee   : > { %v374_v0 = vmul.f32 %v339_v60, %v298_v55  ;;  %v375_v1 = vmul.f32 %v338_v59, %v299_v56  ;;  %v481_v60 = vld [vmem:[#allocation7 + $0x68] sm:$0xff] }
  0xef   : > { %417 = vmatpush1.bf16.msra.mxu0 %v390_v61 }
  0xf0   : > { %v313_v2 = vpop.permute.xlu1 %312  ;;  %v311_v3 = vpop.permute.xlu0 %310  ;;  %v389_v4 = vpack.c.bf16 %v375_v1, %v373_v63  ;;  %v388_v5 = vpack.c.bf16 %v374_v0, %v372_v62  ;;  %v482_v63 = vld [vmem:[#allocation7 + $0x70] sm:$0xff]  ;;  %v483_v0 = vld [vmem:[#allocation7 + $0x78] sm:$0xff] }
  0xf1   : > { %v317_v9 = vsel %vm316_vm7, %v311_v3, %v313_v2  ;;  %v318_v10 = vsel %vm316_vm7, %v313_v2, %v311_v3 }
  0xf2   : > { %418 = vmatprep.subr.bf16.mxu0 %v389_v4  ;;  %v368_v17 = vmul.f32 %v318_v10, %v292_v6  ;;  %v369_v18 = vmul.f32 %v317_v9, %v293_v7  ;;  %v477_v10 = vld [vmem:[#allocation7 + $0x48] sm:$0xff] }
  0xf3   : > { %419 = vmatpush1.bf16.msra.mxu0 %v388_v5 }
  0xf4   : > { %v322_v13 = vpop.permute.xlu1 %321  ;;  %v320_v14 = vpop.permute.xlu0 %319 }
  0xf5   : > { %v324_v15 = vsel %vm323_vm8, %v320_v14, %v322_v13  ;;  %v325_v16 = vsel %vm323_vm8, %v322_v13, %v320_v14  ;;  %v476_v13 = vld [vmem:[#allocation7 + $0x40] sm:$0xff] }
  0xf6   : > { %v370_v19 = vmul.f32 %v325_v16, %v294_v11  ;;  %v371_v20 = vmul.f32 %v324_v15, %v295_v12  ;;  %v478_v11 = vld [vmem:[#allocation7 + $0x50] sm:$0xff]  ;;  %v479_v12 = vld [vmem:[#allocation7 + $0x58] sm:$0xff] }
  0xf8   : > { %v387_v21 = vpack.c.bf16 %v371_v20, %v369_v18  ;;  %v386_v22 = vpack.c.bf16 %v370_v19, %v368_v17 }
  0xfa   : > { %420 = vmatprep.subr.bf16.mxu0 %v387_v21 }
  0xfb   : > { %421 = vmatpush1.bf16.msra.mxu0 %v386_v22 }
  0xfe   : > { %764 = vmatmul.mubr.msk.bf16.vlgmr.msra.gmra.mxu0 %vm396_vm9, %v291_v23 }
 0x1be   : > { %v440_v24 = vpop.f32.mrf.mxu0 }
 0x1bf   : > { %v447_v27 = vmul.f32 %v440_v24, %v440_v24 }
 0x1c0   : > { %v442_v25 = vpop.f32.mrf.mxu0 }
 0x1c1   : > { %v449_v26 = vadd.f32 %v442_v25, %v440_v24  ;;  %v448_v28 = vmul.f32 %v442_v25, %v442_v25 }
 0x1c2   : > { %v444_v29 = vpop.f32.mrf.mxu0 }
 0x1c3   : > { %450 = vadd.xlane.f32.xlu0 %v449_v26  ;;  %v452_v30 = vadd.f32 %v448_v28, %v447_v27  ;;  %v472_v28 = vld [vmem:[#allocation7 + $0x20] sm:$0xff]  ;;  %v473_v29 = vld [vmem:[#allocation7 + $0x28] sm:$0xff] }
 0x1c4   : > { %v445_v31 = vpop.f32.mrf.mxu0 }
 0x1c5   : > { %453 = vadd.xlane.f32.xlu1 %v452_v30 }
 0x24c   : > { %v451_v32 = vpop.xlane.xlu0 %450 }
 0x24d   : > { %v455_v33 = vmul.f32 0.00390625, %v451_v32  ;;  %v474_v32 = vld [vmem:[#allocation7 + $0x30] sm:$0xff] }
 0x24e   : > { %v454_v34 = vpop.xlane.xlu1 %453 }
 0x24f   : > { %v457_v35 = vmul.f32 %v455_v33, %v455_v33  ;;  %v456_v36 = vmul.f32 0.00390625, %v454_v34  ;;  %v459_v39 = vsub.f32 %v440_v24, %v455_v33  ;;  %v460_v40 = vsub.f32 %v442_v25, %v455_v33  ;;  %v475_v33 = vld [vmem:[#allocation7 + $0x38] sm:$0xff] }
 0x251   : > { %v458_v37 = vsub.f32 %v456_v36, %v457_v35 }
 0x253   : > { %v461_v38 = vadd.f32 1e-05, %v458_v37 }
 0x255   : > { %863 = vrsqrt.f32 %v461_v38 }
 0x262   : > { %v864_v41 = vpop.eup %863 }
 0x263   : > { %v463_v42 = vmul.f32 %v864_v41, %v459_v39  ;;  %v464_v43 = vmul.f32 %v864_v41, %v460_v40 }
 0x265   : > { %v465_v44 = vmax.f32 %v463_v42, 0.0  ;;  %v466_v45 = vmax.f32 %v464_v43, 0.0 }
 0x267   : > { %530 = vrot.lane.b32.xlu1 %v466_v45, %s1054_s26  ;;  %528 = vrot.lane.b32.xlu0 %v465_v44, %s1054_s26  ;;  %v543_v22 = vmul.f32 %v477_v10, %v466_v45  ;;  %v542_v23 = vmul.f32 %v476_v13, %v465_v44  ;;  %s1368_s26 = scalar_lea.hbm %s1410_s5, %s773_s14 }
 0x26b   : > { %518 = vrot.lane.b32.xlu1 %v466_v45, %s1053_s24  ;;  %516 = vrot.lane.b32.xlu0 %v465_v44, %s1053_s24 }
 0x26f   : > { %524 = vrot.lane.b32.xlu1 %v466_v45, %s1055_s13  ;;  %522 = vrot.lane.b32.xlu0 %v465_v44, %s1055_s13  ;;  %s635_s13 = scalar_lea.sflag [#allocation4], %s1219_s23 }
 0x273   : > { %512 = vrot.lane.b32.xlu1 %v466_v45, %s1056_s15  ;;  %510 = vrot.lane.b32.xlu0 %v465_v44, %s1056_s15  ;;  %s973_s15 = scalar_lea.vmem %s650_s30, 256 }
 0x274   : > { %p974_p4 = scmp.ne.s32.totalorder %s650_s30, %s973_s15 }
 0x276   : > { %p975_p12 = pnand %p974_p4, %p1428_p6 }
 0x277   : > { %500 = vrot.lane.b32.xlu1 %v466_v45, %s1057_s16  ;;  %498 = vrot.lane.b32.xlu0 %v465_v44, %s1057_s16  ;;  %s977_s16 = sshll.u32 %s1062_s22, 4  ;;  %s978_s16 = int_to_ptr.vmem [resolvable:$false] %s977_s16 }
 0x278   : > { %p976_p0 = pneg %p975_p12  ;;  %p980_p5 = scmp.lt.s32.totalorder %s650_s30, %s978_s16 }
 0x27b   : > { %506 = vrot.lane.b32.xlu1 %v466_v45, %s1058_s17  ;;  %504 = vrot.lane.b32.xlu0 %v465_v44, %s1058_s17  ;;  %s979_s17 = scalar_lea.vmem %s978_s16, 512 }
 0x27c   : > { %p981_p3 = scmp.lt.s32.totalorder %s979_s17, %s973_s15 }
 0x27e   : > { %p982_p7 = por %p981_p3, %p980_p5 }
 0x27f   : > { %488 = vrot.lane.b32.xlu1 %v466_v45, %s1060_s10  ;;  %486 = vrot.lane.b32.xlu0 %v465_v44, %s1060_s10 }
 0x280   : > { %p983_p9 = pnand %p982_p7, %p976_p0 }
 0x283   : > { %494 = vrot.lane.b32.xlu1 %v466_v45, %s1061_s8  ;;  %492 = vrot.lane.b32.xlu0 %v465_v44, %s1061_s8 }
 0x2d9   : > { %v531_v48 = vpop.permute.xlu1 %530  ;;  %v529_v49 = vpop.permute.xlu0 %528 }
 0x2da   : > { %v532_v50 = vsel %vm365_vm3, %v529_v49, %v531_v48  ;;  %v533_v51 = vsel %vm365_vm3, %v531_v48, %v529_v49 }
 0x2db   : > { %v550_v52 = vmul.f32 %v532_v50, %v484_v46  ;;  %v551_v53 = vmul.f32 %v533_v51, %v485_v47  ;;  %v468_v46 = vld [vmem:[#allocation7] sm:$0xff]  ;;  %v469_v47 = vld [vmem:[#allocation7 + $0x8] sm:$0xff]  ;;  %v470_v50 = vld [vmem:[#allocation7 + $0x10] sm:$0xff] }
 0x2dc   : > { %v471_v51 = vld [vmem:[#allocation7 + $0x18] sm:$0xff] }
 0x2dd   : > { %v519_v54 = vpop.permute.xlu1 %518  ;;  %v517_v55 = vpop.permute.xlu0 %516  ;;  %v561_v56 = vpack.c.bf16 %v551_v53, %v551_v53  ;;  %v560_v57 = vpack.c.bf16 %v550_v52, %v550_v52 }
 0x2de   : > { %v520_v61 = vsel %vm351_vm1, %v517_v55, %v519_v54  ;;  %v521_v62 = vsel %vm351_vm1, %v519_v54, %v517_v55 }
 0x2df   : > { %765 = vmatprep.subr.msk.bf16.mxu1 %vm288_vm0, %v561_v56  ;;  %v566_v59 = vsel %vm288_vm0, %v560_v57, 0  ;;  %v546_v5 = vmul.f32 %v520_v61, %v480_v58  ;;  %v547_v6 = vmul.f32 %v521_v62, %v481_v60  ;;  %v467_v62 = vld [vmem:[#allocation8] sm:$0xf] }
 0x2e0   : > { %578 = vmatpush1.bf16.msra.mxu1 %v566_v59 }
 0x2e1   : > { %v525_v1 = vpop.permute.xlu1 %524  ;;  %v523_v2 = vpop.permute.xlu0 %522 }
 0x2e2   : > { %v526_v3 = vsel %vm358_vm2, %v523_v2, %v525_v1  ;;  %v527_v4 = vsel %vm358_vm2, %v525_v1, %v523_v2 }
 0x2e3   : > { %v548_v7 = vmul.f32 %v526_v3, %v482_v63  ;;  %v549_v9 = vmul.f32 %v527_v4, %v483_v0 }
 0x2e5   : > { %v513_v14 = vpop.permute.xlu1 %512  ;;  %v511_v15 = vpop.permute.xlu0 %510  ;;  %v559_v16 = vpack.c.bf16 %v549_v9, %v547_v6  ;;  %v558_v17 = vpack.c.bf16 %v548_v7, %v546_v5 }
 0x2e6   : > { %v514_v18 = vsel %vm344_vm4, %v511_v15, %v513_v14  ;;  %v515_v19 = vsel %vm344_vm4, %v513_v14, %v511_v15 }
 0x2e7   : > { %v544_v20 = vmul.f32 %v514_v18, %v478_v11  ;;  %v545_v21 = vmul.f32 %v515_v19, %v479_v12  ;;  %579 = vmatprep.subr.bf16.mxu1 %v559_v16 }
 0x2e8   : > { %580 = vmatpush1.bf16.msra.mxu1 %v558_v17 }
 0x2e9   : > { %v501_v24 = vpop.permute.xlu1 %500  ;;  %v499_v25 = vpop.permute.xlu0 %498  ;;  %v557_v26 = vpack.c.bf16 %v545_v21, %v543_v22  ;;  %v556_v27 = vpack.c.bf16 %v544_v20, %v542_v23 }
 0x2ea   : > { %v502_v30 = vsel %vm330_vm5, %v499_v25, %v501_v24  ;;  %v503_v31 = vsel %vm330_vm5, %v501_v24, %v499_v25 }
 0x2eb   : > { %581 = vmatprep.subr.bf16.mxu1 %v557_v26  ;;  %v538_v38 = vmul.f32 %v503_v31, %v472_v28  ;;  %v539_v39 = vmul.f32 %v502_v30, %v473_v29 }
 0x2ec   : > { %582 = vmatpush1.bf16.msra.mxu1 %v556_v27 }
 0x2ed   : > { %v507_v34 = vpop.permute.xlu1 %506  ;;  %v505_v35 = vpop.permute.xlu0 %504 }
 0x2ee   : > { %v508_v36 = vsel %vm337_vm6, %v505_v35, %v507_v34  ;;  %v509_v37 = vsel %vm337_vm6, %v507_v34, %v505_v35 }
 0x2ef   : > { %v540_v40 = vmul.f32 %v509_v37, %v474_v32  ;;  %v541_v41 = vmul.f32 %v508_v36, %v475_v33 }
 0x2f1   : > { %v489_v42 = vpop.permute.xlu1 %488  ;;  %v487_v43 = vpop.permute.xlu0 %486  ;;  %v555_v44 = vpack.c.bf16 %v541_v41, %v539_v39  ;;  %v554_v45 = vpack.c.bf16 %v540_v40, %v538_v38 }
 0x2f2   : > { %v490_v48 = vsel %vm316_vm7, %v487_v43, %v489_v42  ;;  %v491_v49 = vsel %vm316_vm7, %v489_v42, %v487_v43 }
 0x2f3   : > { %583 = vmatprep.subr.bf16.mxu1 %v555_v44  ;;  %v534_v56 = vmul.f32 %v491_v49, %v468_v46  ;;  %v535_v57 = vmul.f32 %v490_v48, %v469_v47 }
 0x2f4   : > { %584 = vmatpush1.bf16.msra.mxu1 %v554_v45 }
 0x2f5   : > { %v495_v52 = vpop.permute.xlu1 %494  ;;  %v493_v53 = vpop.permute.xlu0 %492 }
 0x2f6   : > { %v496_v54 = vsel %vm323_vm8, %v493_v53, %v495_v52  ;;  %v497_v55 = vsel %vm323_vm8, %v495_v52, %v493_v53 }
 0x2f7   : > { %v536_v58 = vmul.f32 %v497_v55, %v470_v50  ;;  %v537_v59 = vmul.f32 %v496_v54, %v471_v51 }
 0x2f9   : > { %v553_v60 = vpack.c.bf16 %v537_v59, %v535_v57  ;;  %v552_v61 = vpack.c.bf16 %v536_v58, %v534_v56 }
 0x2fb   : > { %585 = vmatprep.subr.bf16.mxu1 %v553_v60 }
 0x2fc   : > { %586 = vmatpush1.bf16.msra.mxu1 %v552_v61 }
 0x2ff   : > { %766 = vmatmul.mubr.msk.bf16.vlgmr.msra.gmra.mxu1 %vm396_vm9, %v467_v62 }
 0x3bf   : > { %v605_v63 = vpop.f32.mrf.mxu1 }
 0x3c0   : > { %v612_v2 = vmul.f32 %v605_v63, %v605_v63 }
 0x3c1   : > { %v607_v0 = vpop.f32.mrf.mxu1 }
 0x3c2   : > { %v614_v1 = vadd.f32 %v607_v0, %v605_v63  ;;  %v613_v3 = vmul.f32 %v607_v0, %v607_v0 }
 0x3c3   : > { %v609_v4 = vpop.f32.mrf.mxu1 }
 0x3c4   : > { %615 = vadd.xlane.f32.xlu0 %v614_v1  ;;  %v617_v8 = vadd.f32 %v613_v3, %v612_v2 }
 0x3c5   : > { %v610_v5 = vpop.f32.mrf.mxu1 }
 0x3c6   : > { %618 = vadd.xlane.f32.xlu1 %v617_v8 }
 0x44d   : > { %v616_v6 = vpop.xlane.xlu0 %615 }
 0x44e   : > { %v620_v7 = vmul.f32 0.00390625, %v616_v6 }
 0x44f   : > { %v619_v9 = vpop.xlane.xlu1 %618 }
 0x450   : > { %v622_v10 = vmul.f32 %v620_v7, %v620_v7  ;;  %v621_v11 = vmul.f32 0.00390625, %v619_v9  ;;  %v624_v14 = vsub.f32 %v605_v63, %v620_v7  ;;  %v625_v15 = vsub.f32 %v607_v0, %v620_v7 }
 0x452   : > { %v623_v12 = vsub.f32 %v621_v11, %v622_v10 }
 0x454   : > { %v626_v13 = vadd.f32 1e-05, %v623_v12 }
 0x456   : > { %865 = vrsqrt.f32 %v626_v13 }
 0x463   : > { %v866_v16 = vpop.eup %865 }
 0x464   : > { %v628_v17 = vmul.f32 %v866_v16, %v624_v14  ;;  %v629_v18 = vmul.f32 %v866_v16, %v625_v15 }
 0x466   : > { %v630_v19 = vmax.f32 %v628_v17, 0.0  ;;  %v631_v20 = vmax.f32 %v629_v18, 0.0 }
 0x468   : > { %632 = vst [vmem:[%s282_s27] sm:$0xff] %v630_v19  ;;  %633 = vst [vmem:[%s282_s27 + $0x8] sm:$0xff] %v631_v20 }
 0x469   : > { %986 = shalt.err (!%p983_p9)
}
 0x46a   : > { %s987_s10 = scalar_lea.hbm %s1368_s26, 256  ;;  %s991_s11 = scalar_lea.hbm %s1410_s5, 512 }
 0x46b   : > { %p988_p13 = scmp.ne.s32.totalorder %s1368_s26, %s987_s10  ;;  %p992_p10 = scmp.lt.s32.totalorder %s1368_s26, %s1410_s5 }
 0x46c   : > { %p993_p11 = scmp.lt.s32.totalorder %s991_s11, %s987_s10 }
 0x46d   : > { %p989_p1 = pnand %p988_p13, %p1428_p6 }
 0x46e   : > { %p994_p2 = por %p993_p11, %p992_p10 }
 0x46f   : > { %p990_p8 = pneg %p989_p1 }
 0x471   : > { %p995_p4 = pnand %p994_p2, %p990_p8 }
 0x473   : > { %998 = shalt.err (!%p995_p4)
}
 0x474   : > { %788 = dma.vmem_to_hbm [thread:$0]  (%p1428_p6), %s650_s30, 256, %s1368_s26, %s635_s13  }
 0x475 PF: > { %s661_s14 = sand.u32 1, %s1033_s18   ;;  %p1429_p12 = scmp.ne.s32.totalorder %s1416_s25, 0 }
 0x476   : > { %p1430_p0 = scmp.ge.s32.totalorder %s1045_s21, 2  ;;  %s662_s27 = scalar_lea.sflag [#allocation4], %s661_s14 }
 0x478   : > { %p805_p5 = pnand %p1430_p0, %p1429_p12 }
 0x47a   : > { %p806_p3 = pneg %p805_p5 }
 0x47c   : > { %1028 = dma.done.wait (%p806_p3), %s662_s27, 256  }
 0x47d   : > { %1030 = vsyncadd (%p806_p3), %s662_s27, 4294967040  ;;  %p20_p7 = scmp.ge.s32.totalorder %s1173_s28, 4   ;;  %s1431_s18 = smov %s1037_s19 }
 0x47e   : > { %s1432_s19 = smov %s1041_s20  ;;  %s1433_s20 = smov %s1183_s6 }
 0x47f   : > { %s1434_s21 = smov %s1173_s28  ;;  %22 = sbr.rel (!%p20_p7) target bundleno = 7 (0x7), region = 97 }
 0x484   :  { %667 = vsyncpa [#allocation3], 1 }
 0x485   :  { %669 = vsyncpa [#allocation3 + $0x1], 1 }
 0x486   :  { %670 = vsyncpa [#allocation6], 1 }
 0x487   :  { %671 = vsyncpa [#allocation9], 1 }
 0x488   :  { %672 = vsyncpa [#allocation4], 1 }
 0x489   :  { %674 = vsyncpa [#allocation4 + $0x1], 1 }

</bundles_post_ra>
